<compile_context>
chip_gen: v7x
topology: tpu7x:2x2x1
jax: 0.10.0
libtpu: 0.0.40
codegen_flags: <defaults>
</compile_context>

<pallas_src>
import jax
import jax.numpy as jnp
from jax.experimental import pallas as pl
from jax.experimental.pallas import tpu as pltpu


def _act_kernel(x_ref, o_ref):
    x = x_ref[...]
    r = jnp.maximum(x, 0)      # relu; scalar 0 avoids materializing a zeros tile
    o_ref[...] = r * r * r     # x**3 via two VPU muls (exact same FP result)


def _choose_lanes(total):
    # Prefer a lane width that divides the flat size (no padding); otherwise
    # fall back to 1024 lanes and pad the tail (< 1024 extra elements).
    for lanes in (4096, 2048, 1024, 512, 256, 128):
        if total % lanes == 0:
            return lanes
    return 1024


def _round_down(v, m):
    return (v // m) * m


def act_op(x):
    """Computes relu(x) ** 3 elementwise via a lane-dense Pallas TPU kernel.

    Accepts any shape / floating dtype; semantics are layout-agnostic.
    """
    orig_shape = x.shape
    orig_dtype = x.dtype
    total = x.size

    if total == 0:
        return x

    # ---- Flatten to a lane-dense 2D slab (rows, lanes) ----------------------
    lanes = _choose_lanes(total)
    flat = x.reshape(-1)
    pad = (-total) % lanes
    if pad:
        # Zero padding is inert: relu(0)**3 == 0, and it is sliced off below.
        flat = jnp.pad(flat, (0, pad))
    rows = flat.size // lanes
    x2 = flat.reshape(rows, lanes)

    # ---- Pick the row-block size --------------------------------------------
    itemsize = jnp.dtype(orig_dtype).itemsize
    # dtype-aware sublane packing unit: f32 -> 8, bf16/f16 -> 16, int8/fp8 -> 32
    sub = {4: 8, 2: 16, 1: 32}.get(itemsize, 8)

    # ~2 MiB per block: ~85%+ of HBM roofline in measured sweeps, and
    # 4 double-buffered blocks (in + out) fit every generation's scoped VMEM.
    target_block_bytes = 2 * 1024 * 1024
    br = max(sub, _round_down(target_block_bytes // (lanes * itemsize), sub))

    if rows <= sub:
        # Tiny input: full-extent row block (legal even if not sublane-aligned).
        br = rows
    else:
        # Keep >= 2 grid points so both TensorCores on v7x can share the work;
        # ragged remainder rows are handled by cdiv + Pallas edge masking.
        half = _round_down(pl.cdiv(rows, 2), sub)
        br = max(sub, min(br, half if half > 0 else sub))

    grid = (pl.cdiv(rows, br),)

    out = pl.pallas_call(
        _act_kernel,
        out_shape=jax.ShapeDtypeStruct((rows, lanes), orig_dtype),
        grid_spec=pltpu.PrefetchScalarGridSpec(
            num_scalar_prefetch=0,
            grid=grid,
            in_specs=[pl.BlockSpec((br, lanes), lambda i: (i, 0))],
            out_specs=pl.BlockSpec((br, lanes), lambda i: (i, 0)),
        ),
        compiler_params=pltpu.CompilerParams(
            dimension_semantics=("parallel",),
            # Modest headroom; safe on v5e/v6e (128 MiB phys) and v7x (64 MiB).
            vmem_limit_bytes=32 * 1024 * 1024,
        ),
    )(x2)

    out_flat = out.reshape(-1)
    if pad:
        out_flat = out_flat[:total]
    return out_flat.reshape(orig_shape)


if __name__ == "__main__":
    key = jax.random.PRNGKey(0)

    # Small NCHW-style input consistent with a typical activation-op usage.
    x = jax.random.normal(key, (2, 4, 16, 16), dtype=jnp.float32)
    y = act_op(x)
    jax.block_until_ready(y)
    ref = jnp.maximum(x, 0.0) ** 3
    assert y.shape == x.shape and y.dtype == x.dtype
    assert jnp.allclose(y, ref, atol=1e-6, rtol=1e-6), "mismatch vs reference (NCHW case)"

    # Awkward shape exercising the padding / tiny-rows path.
    x2 = jax.random.normal(jax.random.PRNGKey(1), (3, 5, 7, 11), dtype=jnp.float32)
    y2 = act_op(x2)
    jax.block_until_ready(y2)
    ref2 = jnp.maximum(x2, 0.0) ** 3
    assert y2.shape == x2.shape and y2.dtype == x2.dtype
    assert jnp.allclose(y2, ref2, atol=1e-6, rtol=1e-6), "mismatch vs reference (awkward case)"

    # Slightly larger shape exercising the multi-program (2+ grid points) path.
    x3 = jax.random.normal(jax.random.PRNGKey(2), (8, 32, 32, 32), dtype=jnp.float32)
    y3 = act_op(x3)
    jax.block_until_ready(y3)
    ref3 = jnp.maximum(x3, 0.0) ** 3
    assert y3.shape == x3.shape and y3.dtype == x3.dtype
    assert jnp.allclose(y3, ref3, atol=1e-6, rtol=1e-6), "mismatch vs reference (multi-block case)"

    print("KERNEL_OK")
</pallas_src>

<mosaic_0001>
module attributes {stable_mosaic.version = 11 : i64} {
  func.func @_act_kernel(%arg0: i32, %arg1: memref<1x2048xf32, #tpu.memory_space<vmem>>, %arg2: memref<1x2048xf32, #tpu.memory_space<vmem>>) attributes {dimension_semantics = [#tpu.dimension_semantics<parallel>], iteration_bounds = array<i64: 1>, scalar_prefetch = 0 : i64, scratch_operands = 0 : i64, tpu.core_type = #tpu.core_type<tc>, window_params = [{transform_indices = @transform_0, window_bounds = array<i64: 1, 2048>}, {transform_indices = @transform_1, window_bounds = array<i64: 1, 2048>}]} {
    %c0 = arith.constant 0 : index
    %c0_0 = arith.constant 0 : index
    %0 = vector.load %arg1[%c0, %c0_0] : memref<1x2048xf32, #tpu.memory_space<vmem>>, vector<1x2048xf32>
    %cst = arith.constant 0.000000e+00 : f32
    %1 = vector.broadcast %cst : f32 to vector<1x2048xf32>
    %2 = arith.maximumf %0, %1 : vector<1x2048xf32>
    %3 = arith.mulf %2, %2 : vector<1x2048xf32>
    %4 = arith.mulf %3, %2 : vector<1x2048xf32>
    %c0_1 = arith.constant 0 : index
    %c0_2 = arith.constant 0 : index
    %5 = vector.load %arg2[%c0_1, %c0_2] : memref<1x2048xf32, #tpu.memory_space<vmem>>, vector<1x2048xf32>
    tpu.vector_store %arg2[%c0_1, %c0_2], %4 {strides = array<i32>} : memref<1x2048xf32, #tpu.memory_space<vmem>>, vector<1x2048xf32>,
    return
  }
  func.func @transform_0(%arg0: i32) -> (i32, i32) {
    %c0_i32 = arith.constant 0 : i32
    %c0_i32_0 = arith.constant 0 : i32
    return %arg0, %c0_i32 : i32, i32
  }
  func.func @transform_1(%arg0: i32) -> (i32, i32) {
    %c0_i32 = arith.constant 0 : i32
    %c0_i32_0 = arith.constant 0 : i32
    return %arg0, %c0_i32 : i32, i32
  }
}

</mosaic_0001>

<bundles_post_ra>
// kernel: tpu_custom_call.1
= control target key start
LH: loop header
LB: loop body
LE: loop exit
PB: predicated region body
PF: predicated region fallthrough
CT: control target
= control target key end

     0   :  { %6 = vsyncpa [#allocation3], 0  ;;  %s132_s0 = inlined_call_operand.hbm [shape: f32[1,2048], index: 0, kind: input, shape index: {}]   ;;  %s133_s1 = inlined_call_operand.hbm [shape: f32[1,2048], index: 1, kind: output, shape index: {}]  }
   0x1   :  { %7 = vsyncpa [#allocation4], 0  ;;  %s96_s6 = smov [#allocation2]   ;;  %s48_s10 = scalar_lea.hbm %s132_s0, 256 }
   0x2   :  { %s14_s7 = sshll.u32 %s96_s6, 4  ;;  %p49_p0 = scmp.ne.s32.totalorder %s132_s0, %s48_s10  ;;  %s15_s7 = int_to_ptr.vmem [resolvable:$true] %s14_s7 }
   0x3   :  { %p52_p1 = scmp.lt.u32.totalorder %s48_s10, %s132_s0 }
   0x5   :  { %p54_p2 = pnand %p52_p1, %p49_p0 }
   0x7   :  { %57 = shalt.err (!%p54_p2)
}
   0x8   :  { %s58_s15 = scalar_lea.vmem %s15_s7, 256  ;;  %p63_p4 = scmp.lt.s32.totalorder %s15_s7, %s15_s7 }
   0x9   :  { %p59_p3 = scmp.ne.s32.totalorder %s15_s7, %s58_s15  ;;  %p64_p5 = scmp.lt.s32.totalorder %s58_s15, %s58_s15 }
   0xb   :  { %p65_p6 = por %p64_p5, %p63_p4 }
   0xd   :  { %p66_p7 = pnand %p65_p6, %p59_p3 }
   0xf   :  { %69 = shalt.err (!%p66_p7)
}
  0x10   :  { %17 = dma.hbm_to_vmem [thread:$0]  %s132_s0, 256, %s15_s7, [#allocation3]  }
  0x11   :  { %92 = dma.done.wait [#allocation3], 256  }
  0x12   :  { %93 = vsyncadd [#allocation3], 4294967040  ;;  %v21_v0 = vld [vmem:[#allocation2] sm:$0xff]  ;;  %v22_v1 = vld [vmem:[#allocation2 + $0x8] sm:$0xff]  ;;  %s97_s18 = smov [#allocation5]  }
  0x13   :  { %v23_v2 = vmax.f32 %v21_v0, 0.0  ;;  %v24_v3 = vmax.f32 %v22_v1, 0.0  ;;  %s37_s19 = sshll.u32 %s97_s18, 4  ;;  %s38_s19 = int_to_ptr.vmem [resolvable:$true] %s37_s19 }
  0x14   :  { %s70_s20 = scalar_lea.vmem %s38_s19, 256  ;;  %p75_p9 = scmp.lt.s32.totalorder %s38_s19, %s38_s19 }
  0x15   :  { %v25_v4 = vmul.f32 %v23_v2, %v23_v2  ;;  %v26_v5 = vmul.f32 %v24_v3, %v24_v3  ;;  %p71_p8 = scmp.ne.s32.totalorder %s38_s19, %s70_s20  ;;  %p76_p10 = scmp.lt.s32.totalorder %s70_s20, %s70_s20 }
  0x17   :  { %v27_v6 = vmul.f32 %v25_v4, %v23_v2  ;;  %v28_v7 = vmul.f32 %v26_v5, %v24_v3  ;;  %p77_p11 = por %p76_p10, %p75_p9 }
  0x19   :  { %29 = vst [vmem:[#allocation5] sm:$0xff] %v27_v6  ;;  %30 = vst [vmem:[#allocation5 + $0x8] sm:$0xff] %v28_v7  ;;  %p78_p12 = pnand %p77_p11, %p71_p8 }
  0x1b   :  { %81 = shalt.err (!%p78_p12)
}
  0x1c   :  { %s82_s22 = scalar_lea.hbm %s133_s1, 256 }
  0x1d   :  { %p83_p13 = scmp.ne.s32.totalorder %s133_s1, %s82_s22  ;;  %p86_p0 = scmp.lt.u32.totalorder %s82_s22, %s133_s1 }
  0x1f   :  { %p88_p1 = pnand %p86_p0, %p83_p13 }
  0x21   :  { %91 = shalt.err (!%p88_p1)
}
  0x22   :  { %40 = dma.vmem_to_hbm [thread:$0]  %s38_s19, 256, %s133_s1, [#allocation4]  }
  0x23   :  { %94 = dma.done.wait [#allocation4], 256  }
  0x24   :  { %95 = vsyncadd [#allocation4], 4294967040 }
  0x25   :  { %44 = vsyncpa [#allocation3], 1 }
  0x26   :  { %45 = vsyncpa [#allocation4], 1 }

</bundles_post_ra>
